<compile_context>
chip_gen: v6e
topology: v6e:2x2x1
jax: 0.10.0
libtpu: 0.0.40
codegen_flags: <defaults>
</compile_context>

<pallas_src>
import functools

import jax
import jax.numpy as jnp
from jax import lax
from jax.experimental import pallas as pl
from jax.experimental.pallas import tpu as pltpu


# dimension_numbers for  A(m, k) . B(n, k)^T -> (m, n)   (same idiom as flash attn)
_NT_DIMS = (((1,), (1,)), ((), ()))


def _fused_kernel(idx_ref, width_ref, height_ref, feat_ref, bias_ref, x_ref,
                  o_ref, *, eps, normalize):
    """Grid step (m, kt): o[m-tile] += x[m-tile, kt-slab] @ weight[:, kt-slab].T (+bias @ kt==0)."""
    kt = pl.program_id(1)

    K, n, W = width_ref.shape
    H = height_ref.shape[2]
    C = feat_ref.shape[1]
    tk = idx_ref.shape[1]

    # Per-lane (c, w, h) decomposition of the flat D axis for this slab.
    idx = idx_ref[...]                       # (3, tk) int32
    c_idx = idx[0:1, :]                      # (1, tk)
    w_idx = idx[1:2, :]
    h_idx = idx[2:3, :]

    # One-hot expansion matrices (2-D iota + integer compare; no gathers, no reshapes).
    c_oh = (c_idx == lax.broadcasted_iota(jnp.int32, (C, tk), 0)).astype(jnp.float32)
    w_oh = (w_idx == lax.broadcasted_iota(jnp.int32, (W, tk), 0)).astype(jnp.float32)
    h_oh = (h_idx == lax.broadcasted_iota(jnp.int32, (H, tk), 0)).astype(jnp.float32)

    # features[o, c_idx[j]]  -> (n, tk), lane-dense.
    f_exp = jnp.dot(feat_ref[...].astype(jnp.float32), c_oh,
                    preferred_element_type=jnp.float32)

    # spatial[o, j] = sum_k wn[o, k, w_idx[j]] * hn[o, k, h_idx[j]]
    spatial = jnp.zeros((n, tk), jnp.float32)
    for k in range(K):                                   # components: tiny static rank
        wk = width_ref[k].astype(jnp.float32)            # (n, W)  - W on the lane axis
        hk = height_ref[k].astype(jnp.float32)           # (n, H)
        if normalize:                                    # L2 normalize over W / H, eps inside sqrt
            wk = wk / jnp.sqrt(jnp.sum(wk * wk, axis=-1, keepdims=True) + eps)
            hk = hk / jnp.sqrt(jnp.sum(hk * hk, axis=-1, keepdims=True) + eps)
        w_rep = jnp.dot(wk, w_oh, preferred_element_type=jnp.float32)   # (n, tk)
        h_rep = jnp.dot(hk, h_oh, preferred_element_type=jnp.float32)   # (n, tk)
        spatial = spatial + w_rep * h_rep

    w_slab = f_exp * spatial                             # (n, tk) == weight[:, kt-slab]

    # Initialize the resident output block with the bias on the first reduction step.
    @pl.when(kt == 0)
    def _():
        o_ref[...] = jnp.broadcast_to(bias_ref[...], o_ref.shape).astype(o_ref.dtype)

    x_blk = x_ref[...]
    o_ref[...] += lax.dot_general(x_blk, w_slab.astype(x_blk.dtype), _NT_DIMS,
                                  preferred_element_type=jnp.float32)


def _pick_tile(dim, unit, cap):
    """Largest multiple of `unit` that divides `dim` and is <= cap; falls back to `dim`."""
    best = None
    t = unit
    while t <= min(cap, dim):
        if dim % t == 0:
            best = t
        t += unit
    return dim if best is None else best


def width_height_feature_linear(x, width, height, features, bias=None, *,
                                eps=1e-6, normalize=True,
                                tm_max=512, tk_max=2048):
    """y = x.view(N,-1) @ weight.T + bias with the factorized weight built in-kernel.

    x:        (N, C, W, H)
    width:    (outdims, W, components)   <- squeezed torch Parameter (outdims, 1, W, 1, comp)
    height:   (outdims, H, components)   <- squeezed torch Parameter (outdims, 1, 1, H, comp)
    features: (outdims, C)               <- squeezed torch Parameter (outdims, C, 1, 1)
    bias:     (outdims,) or None
    """
    N, C, W, H = x.shape
    n, W2, K = width.shape
    assert W2 == W
    assert height.shape == (n, H, K), \
        "The number of components in width and height do not agree"
    assert features.shape == (n, C)
    D = C * W * H

    # ---- host-side layout plumbing (free views / tiny parameter transposes) ----
    x2 = x.reshape(N, D)                              # contiguous collapse -> free
    w3 = jnp.transpose(width, (2, 0, 1))              # (K, n, W), tiny
    h3 = jnp.transpose(height, (2, 0, 1))             # (K, n, H), tiny
    if bias is None:
        bias = jnp.zeros((n,), jnp.float32)
    bias2 = bias.reshape(1, n).astype(jnp.float32)

    # Flat-index -> (c, w, h) lookup table, streamed at ~12 bytes per weight column.
    d = jnp.arange(D, dtype=jnp.int32)
    idx = jnp.stack([d // (W * H), (d // H) % W, d % H], axis=0)   # (3, D)

    # Tile sizes: lane-aligned reduction slab (multiple of 128 or all of D), and a
    # sublane-aligned M tile (or all of N).  Keep the (outdims, tk) slab intermediates
    # modest so the whole step fits comfortably in v7x's smaller scoped VMEM.
    slab_budget = 8 * 1024 * 1024
    tk_cap = max(128, min(tk_max, (slab_budget // max(1, 16 * n)) // 128 * 128))
    tk = _pick_tile(D, 128, tk_cap)
    tm = _pick_tile(N, 8, tm_max)
    grid = (N // tm, D // tk)

    kernel = functools.partial(_fused_kernel, eps=float(eps), normalize=normalize)

    return pl.pallas_call(
        kernel,
        out_shape=jax.ShapeDtypeStruct((N, n), jnp.float32),
        grid_spec=pltpu.PrefetchScalarGridSpec(
            num_scalar_prefetch=0,
            grid=grid,
            in_specs=[
                pl.BlockSpec((3, tk), lambda m, kt: (0, kt)),       # index table slab
                pl.BlockSpec((K, n, W), lambda m, kt: (0, 0, 0)),   # width    (resident)
                pl.BlockSpec((K, n, H), lambda m, kt: (0, 0, 0)),   # height   (resident)
                pl.BlockSpec((n, C), lambda m, kt: (0, 0)),         # features (resident)
                pl.BlockSpec((1, n), lambda m, kt: (0, 0)),         # bias     (resident)
                pl.BlockSpec((tm, tk), lambda m, kt: (m, kt)),      # x tile
            ],
            out_specs=pl.BlockSpec((tm, n), lambda m, kt: (m, 0)),  # resident over kt
        ),
        compiler_params=pltpu.CompilerParams(
            dimension_semantics=("parallel", "arbitrary")),
    )(idx, w3, h3, features, bias2, x2)


def _reference(x, width, height, features, bias, eps=1e-6):
    """Pure-JAX replica of the PyTorch forward for verification."""
    N = x.shape[0]
    n = width.shape[0]
    wn = width / jnp.sqrt(jnp.sum(width ** 2, axis=1, keepdims=True) + eps)
    hn = height / jnp.sqrt(jnp.sum(height ** 2, axis=1, keepdims=True) + eps)
    spatial = jnp.einsum('nwk,nhk->nwh', wn, hn)
    weight = (spatial[:, None, :, :] * features[:, :, None, None]).reshape(n, -1)
    return x.reshape(N, -1) @ weight.T + bias[None, :]


if __name__ == "__main__":
    key = jax.random.PRNGKey(0)
    # in_shape = (c, w, h), small shapes
    N, c, w, h = 2, 4, 16, 16
    outdims, components = 8, 2
    init_noise = 1e-3  # matches module.initialize()

    k1, k2, k3, kx = jax.random.split(key, 4)
    width = init_noise * jax.random.normal(k1, (outdims, w, components), jnp.float32)
    height = init_noise * jax.random.normal(k2, (outdims, h, components), jnp.float32)
    features = init_noise * jax.random.normal(k3, (outdims, c), jnp.float32)
    bias = jnp.zeros((outdims,), jnp.float32)  # bias.data.fill_(0)
    x = jax.random.normal(kx, (N, c, w, h), jnp.float32)

    y = width_height_feature_linear(x, width, height, features, bias)
    y = jax.block_until_ready(y)

    y_ref = _reference(x, width, height, features, bias)
    assert y.shape == (N, outdims)
    assert jnp.allclose(y, y_ref, atol=1e-4, rtol=1e-3), (y, y_ref)
    print("KERNEL_OK")
</pallas_src>

<mosaic_0001>
module attributes {stable_mosaic.version = 11 : i64} {
  func.func @_fused_kernel(%arg0: i32, %arg1: i32, %arg2: memref<3x1024xi32, #tpu.memory_space<vmem>>, %arg3: memref<2x8x16xf32, #tpu.memory_space<vmem>>, %arg4: memref<2x8x16xf32, #tpu.memory_space<vmem>>, %arg5: memref<8x4xf32, #tpu.memory_space<vmem>>, %arg6: memref<1x8xf32, #tpu.memory_space<vmem>>, %arg7: memref<2x1024xf32, #tpu.memory_space<vmem>>, %arg8: memref<2x8xf32, #tpu.memory_space<vmem>>) attributes {dimension_semantics = [#tpu.dimension_semantics<parallel>, #tpu.dimension_semantics<arbitrary>], iteration_bounds = array<i64: 1, 1>, scalar_prefetch = 0 : i64, scratch_operands = 0 : i64, tpu.core_type = #tpu.core_type<tc>, window_params = [{transform_indices = @transform_0, window_bounds = array<i64: 3, 1024>}, {pipeline_mode = #tpu.pipeline_mode<synchronous>, transform_indices = @transform_1, window_bounds = array<i64: 2, 8, 16>}, {pipeline_mode = #tpu.pipeline_mode<synchronous>, transform_indices = @transform_2, window_bounds = array<i64: 2, 8, 16>}, {pipeline_mode = #tpu.pipeline_mode<synchronous>, transform_indices = @transform_3, window_bounds = array<i64: 8, 4>}, {pipeline_mode = #tpu.pipeline_mode<synchronous>, transform_indices = @transform_4, window_bounds = array<i64: 1, 8>}, {transform_indices = @transform_5, window_bounds = array<i64: 2, 1024>}, {transform_indices = @transform_6, window_bounds = array<i64: 2, 8>}]} {
    %c0 = arith.constant 0 : index
    %c0_0 = arith.constant 0 : index
    %0 = vector.load %arg2[%c0, %c0_0] : memref<3x1024xi32, #tpu.memory_space<vmem>>, vector<3x1024xi32>
    %1 = vector.extract_strided_slice %0 {offsets = [0, 0], sizes = [1, 1024], strides = [1, 1]} : vector<3x1024xi32> to vector<1x1024xi32>
    %2 = vector.extract_strided_slice %0 {offsets = [1, 0], sizes = [1, 1024], strides = [1, 1]} : vector<3x1024xi32> to vector<1x1024xi32>
    %3 = vector.extract_strided_slice %0 {offsets = [2, 0], sizes = [1, 1024], strides = [1, 1]} : vector<3x1024xi32> to vector<1x1024xi32>
    %4 = tpu.iota {dimensions = array<i32: 0>} : vector<4x1024xi32>
    %5 = vector.broadcast %1 : vector<1x1024xi32> to vector<4x1024xi32>
    %6 = arith.cmpi eq, %5, %4 : vector<4x1024xi32>
    %7 = arith.extui %6 : vector<4x1024xi1> to vector<4x1024xi32>
    %8 = arith.sitofp %7 : vector<4x1024xi32> to vector<4x1024xf32>
    %9 = tpu.iota {dimensions = array<i32: 0>} : vector<16x1024xi32>
    %10 = vector.broadcast %2 : vector<1x1024xi32> to vector<16x1024xi32>
    %11 = arith.cmpi eq, %10, %9 : vector<16x1024xi32>
    %12 = arith.extui %11 : vector<16x1024xi1> to vector<16x1024xi32>
    %13 = arith.sitofp %12 : vector<16x1024xi32> to vector<16x1024xf32>
    %14 = tpu.iota {dimensions = array<i32: 0>} : vector<16x1024xi32>
    %15 = vector.broadcast %3 : vector<1x1024xi32> to vector<16x1024xi32>
    %16 = arith.cmpi eq, %15, %14 : vector<16x1024xi32>
    %17 = arith.extui %16 : vector<16x1024xi1> to vector<16x1024xi32>
    %18 = arith.sitofp %17 : vector<16x1024xi32> to vector<16x1024xf32>
    %c0_1 = arith.constant 0 : index
    %c0_2 = arith.constant 0 : index
    %19 = vector.load %arg5[%c0_1, %c0_2] : memref<8x4xf32, #tpu.memory_space<vmem>>, vector<8x4xf32>
    %cst = arith.constant dense<0.000000e+00> : vector<8x1024xf32>
    %20 = tpu.matmul %19, %8, %cst {dimension_numbers = #tpu.dot_dimension_numbers<[1], [0], [0], [1], [0, 0, 1, 1], [], []>} : vector<8x4xf32>, vector<4x1024xf32>, vector<8x1024xf32> -> vector<8x1024xf32>
    %cst_3 = arith.constant 0.000000e+00 : f32
    %21 = vector.broadcast %cst_3 : f32 to vector<8x1024xf32>
    %c0_4 = arith.constant 0 : index
    %c0_5 = arith.constant 0 : index
    %c0_6 = arith.constant 0 : index
    %22 = vector.load %arg3[%c0_4, %c0_5, %c0_6] : memref<2x8x16xf32, #tpu.memory_space<vmem>>, vector<1x8x16xf32>
    %23 = vector.shape_cast %22 : vector<1x8x16xf32> to vector<8x16xf32>
    %c0_7 = arith.constant 0 : index
    %c0_8 = arith.constant 0 : index
    %c0_9 = arith.constant 0 : index
    %24 = vector.load %arg4[%c0_7, %c0_8, %c0_9] : memref<2x8x16xf32, #tpu.memory_space<vmem>>, vector<1x8x16xf32>
    %25 = vector.shape_cast %24 : vector<1x8x16xf32> to vector<8x16xf32>
    %26 = arith.mulf %23, %23 : vector<8x16xf32>
    %cst_10 = arith.constant dense<0.000000e+00> : vector<8xf32>
    %27 = vector.multi_reduction <add>, %26, %cst_10 [1] : vector<8x16xf32> to vector<8xf32>
    %28 = vector.shape_cast %27 : vector<8xf32> to vector<8x1xf32>
    %cst_11 = arith.constant 9.99999997E-7 : f32
    %29 = vector.broadcast %cst_11 : f32 to vector<8x1xf32>
    %30 = arith.addf %28, %29 : vector<8x1xf32>
    %31 = math.sqrt %30 : vector<8x1xf32>
    %32 = vector.broadcast %31 : vector<8x1xf32> to vector<8x16xf32>
    %33 = arith.divf %23, %32 : vector<8x16xf32>
    %34 = arith.mulf %25, %25 : vector<8x16xf32>
    %cst_12 = arith.constant dense<0.000000e+00> : vector<8xf32>
    %35 = vector.multi_reduction <add>, %34, %cst_12 [1] : vector<8x16xf32> to vector<8xf32>
    %36 = vector.shape_cast %35 : vector<8xf32> to vector<8x1xf32>
    %cst_13 = arith.constant 9.99999997E-7 : f32
    %37 = vector.broadcast %cst_13 : f32 to vector<8x1xf32>
    %38 = arith.addf %36, %37 : vector<8x1xf32>
    %39 = math.sqrt %38 : vector<8x1xf32>
    %40 = vector.broadcast %39 : vector<8x1xf32> to vector<8x16xf32>
    %41 = arith.divf %25, %40 : vector<8x16xf32>
    %cst_14 = arith.constant dense<0.000000e+00> : vector<8x1024xf32>
    %42 = tpu.matmul %33, %13, %cst_14 {dimension_numbers = #tpu.dot_dimension_numbers<[1], [0], [0], [1], [0, 0, 1, 1], [], []>} : vector<8x16xf32>, vector<16x1024xf32>, vector<8x1024xf32> -> vector<8x1024xf32>
    %cst_15 = arith.constant dense<0.000000e+00> : vector<8x1024xf32>
    %43 = tpu.matmul %41, %18, %cst_15 {dimension_numbers = #tpu.dot_dimension_numbers<[1], [0], [0], [1], [0, 0, 1, 1], [], []>} : vector<8x16xf32>, vector<16x1024xf32>, vector<8x1024xf32> -> vector<8x1024xf32>
    %44 = arith.mulf %42, %43 : vector<8x1024xf32>
    %45 = arith.addf %21, %44 : vector<8x1024xf32>
    %c1 = arith.constant 1 : index
    %c0_16 = arith.constant 0 : index
    %c0_17 = arith.constant 0 : index
    %46 = vector.load %arg3[%c1, %c0_16, %c0_17] : memref<2x8x16xf32, #tpu.memory_space<vmem>>, vector<1x8x16xf32>
    %47 = vector.shape_cast %46 : vector<1x8x16xf32> to vector<8x16xf32>
    %c1_18 = arith.constant 1 : index
    %c0_19 = arith.constant 0 : index
    %c0_20 = arith.constant 0 : index
    %48 = vector.load %arg4[%c1_18, %c0_19, %c0_20] : memref<2x8x16xf32, #tpu.memory_space<vmem>>, vector<1x8x16xf32>
    %49 = vector.shape_cast %48 : vector<1x8x16xf32> to vector<8x16xf32>
    %50 = arith.mulf %47, %47 : vector<8x16xf32>
    %cst_21 = arith.constant dense<0.000000e+00> : vector<8xf32>
    %51 = vector.multi_reduction <add>, %50, %cst_21 [1] : vector<8x16xf32> to vector<8xf32>
    %52 = vector.shape_cast %51 : vector<8xf32> to vector<8x1xf32>
    %cst_22 = arith.constant 9.99999997E-7 : f32
    %53 = vector.broadcast %cst_22 : f32 to vector<8x1xf32>
    %54 = arith.addf %52, %53 : vector<8x1xf32>
    %55 = math.sqrt %54 : vector<8x1xf32>
    %56 = vector.broadcast %55 : vector<8x1xf32> to vector<8x16xf32>
    %57 = arith.divf %47, %56 : vector<8x16xf32>
    %58 = arith.mulf %49, %49 : vector<8x16xf32>
    %cst_23 = arith.constant dense<0.000000e+00> : vector<8xf32>
    %59 = vector.multi_reduction <add>, %58, %cst_23 [1] : vector<8x16xf32> to vector<8xf32>
    %60 = vector.shape_cast %59 : vector<8xf32> to vector<8x1xf32>
    %cst_24 = arith.constant 9.99999997E-7 : f32
    %61 = vector.broadcast %cst_24 : f32 to vector<8x1xf32>
    %62 = arith.addf %60, %61 : vector<8x1xf32>
    %63 = math.sqrt %62 : vector<8x1xf32>
    %64 = vector.broadcast %63 : vector<8x1xf32> to vector<8x16xf32>
    %65 = arith.divf %49, %64 : vector<8x16xf32>
    %cst_25 = arith.constant dense<0.000000e+00> : vector<8x1024xf32>
    %66 = tpu.matmul %57, %13, %cst_25 {dimension_numbers = #tpu.dot_dimension_numbers<[1], [0], [0], [1], [0, 0, 1, 1], [], []>} : vector<8x16xf32>, vector<16x1024xf32>, vector<8x1024xf32> -> vector<8x1024xf32>
    %cst_26 = arith.constant dense<0.000000e+00> : vector<8x1024xf32>
    %67 = tpu.matmul %65, %18, %cst_26 {dimension_numbers = #tpu.dot_dimension_numbers<[1], [0], [0], [1], [0, 0, 1, 1], [], []>} : vector<8x16xf32>, vector<16x1024xf32>, vector<8x1024xf32> -> vector<8x1024xf32>
    %68 = arith.mulf %66, %67 : vector<8x1024xf32>
    %69 = arith.addf %45, %68 : vector<8x1024xf32>
    %70 = arith.mulf %20, %69 : vector<8x1024xf32>
    %c0_i32 = arith.constant 0 : i32
    %71 = arith.cmpi eq, %arg1, %c0_i32 : i32
    %72 = arith.extui %71 : i1 to i32
    %c0_i32_27 = arith.constant 0 : i32
    %73 = arith.cmpi ne, %72, %c0_i32_27 : i32
    scf.if %73 {
      %c0_35 = arith.constant 0 : index
      %c0_36 = arith.constant 0 : index
      %79 = vector.load %arg6[%c0_35, %c0_36] : memref<1x8xf32, #tpu.memory_space<vmem>>, vector<1x8xf32>
      %80 = vector.shape_cast %79 : vector<1x8xf32> to vector<1x8xf32>
      %81 = vector.broadcast %80 : vector<1x8xf32> to vector<2x8xf32>
      %c0_37 = arith.constant 0 : index
      %c0_38 = arith.constant 0 : index
      %82 = vector.load %arg8[%c0_37, %c0_38] : memref<2x8xf32, #tpu.memory_space<vmem>>, vector<2x8xf32>
      tpu.vector_store %arg8[%c0_37, %c0_38], %81 {strides = array<i32>} : memref<2x8xf32, #tpu.memory_space<vmem>>, vector<2x8xf32>,
    } else {
    }
    %c0_28 = arith.constant 0 : index
    %c0_29 = arith.constant 0 : index
    %74 = vector.load %arg7[%c0_28, %c0_29] : memref<2x1024xf32, #tpu.memory_space<vmem>>, vector<2x1024xf32>
    %c0_30 = arith.constant 0 : index
    %c0_31 = arith.constant 0 : index
    %75 = vector.load %arg8[%c0_30, %c0_31] : memref<2x8xf32, #tpu.memory_space<vmem>>, vector<2x8xf32>
    %cst_32 = arith.constant dense<0.000000e+00> : vector<2x8xf32>
    %76 = tpu.matmul %74, %70, %cst_32 {dimension_numbers = #tpu.dot_dimension_numbers<[1], [1], [0], [0], [0, 0, 1, 0], [], []>} : vector<2x1024xf32>, vector<8x1024xf32>, vector<2x8xf32> -> vector<2x8xf32>
    %77 = arith.addf %75, %76 : vector<2x8xf32>
    %c0_33 = arith.constant 0 : index
    %c0_34 = arith.constant 0 : index
    %78 = vector.load %arg8[%c0_33, %c0_34] : memref<2x8xf32, #tpu.memory_space<vmem>>, vector<2x8xf32>
    tpu.vector_store %arg8[%c0_33, %c0_34], %77 {strides = array<i32>} : memref<2x8xf32, #tpu.memory_space<vmem>>, vector<2x8xf32>,
    return
  }
  func.func @transform_0(%arg0: i32, %arg1: i32) -> (i32, i32) {
    %c0_i32 = arith.constant 0 : i32
    %c0_i32_0 = arith.constant 0 : i32
    return %c0_i32, %arg1 : i32, i32
  }
  func.func @transform_1(%arg0: i32, %arg1: i32) -> (i32, i32, i32) {
    %c0_i32 = arith.constant 0 : i32
    %c0_i32_0 = arith.constant 0 : i32
    %c0_i32_1 = arith.constant 0 : i32
    %c0_i32_2 = arith.constant 0 : i32
    return %c0_i32, %c0_i32_0, %c0_i32_1 : i32, i32, i32
  }
  func.func @transform_2(%arg0: i32, %arg1: i32) -> (i32, i32, i32) {
    %c0_i32 = arith.constant 0 : i32
    %c0_i32_0 = arith.constant 0 : i32
    %c0_i32_1 = arith.constant 0 : i32
    %c0_i32_2 = arith.constant 0 : i32
    return %c0_i32, %c0_i32_0, %c0_i32_1 : i32, i32, i32
  }
  func.func @transform_3(%arg0: i32, %arg1: i32) -> (i32, i32) {
    %c0_i32 = arith.constant 0 : i32
    %c0_i32_0 = arith.constant 0 : i32
    %c0_i32_1 = arith.constant 0 : i32
    return %c0_i32, %c0_i32_0 : i32, i32
  }
  func.func @transform_4(%arg0: i32, %arg1: i32) -> (i32, i32) {
    %c0_i32 = arith.constant 0 : i32
    %c0_i32_0 = arith.constant 0 : i32
    %c0_i32_1 = arith.constant 0 : i32
    return %c0_i32, %c0_i32_0 : i32, i32
  }
  func.func @transform_5(%arg0: i32, %arg1: i32) -> (i32, i32) {
    %c0_i32 = arith.constant 0 : i32
    return %arg0, %arg1 : i32, i32
  }
  func.func @transform_6(%arg0: i32, %arg1: i32) -> (i32, i32) {
    %c0_i32 = arith.constant 0 : i32
    %c0_i32_0 = arith.constant 0 : i32
    return %arg0, %c0_i32 : i32, i32
  }
}

</mosaic_0001>

<bundles_post_ra>
// kernel: tpu_custom_call.1
= control target key start
LH: loop header
LB: loop body
LE: loop exit
PB: predicated region body
PF: predicated region fallthrough
CT: control target
= control target key end

     0   :  { %11 = vsyncpa [#allocation3], 0  ;;  %s3139_s0 = inlined_call_operand.hbm [shape: s32[3,1024], index: 0, kind: input, shape index: {}]   ;;  %s3140_s1 = inlined_call_operand.hbm [shape: f32[2,8,16], index: 1, kind: input, shape index: {}]   ;;  %s3141_s2 = inlined_call_operand.hbm [shape: f32[2,8,16], index: 2, kind: input, shape index: {}]   ;;  %s3142_s3 = inlined_call_operand.vmem [shape: f32[8,4], index: 3, kind: input, shape index: {}]   ;;  %s3143_s4 = inlined_call_operand.vmem [shape: f32[1,8], index: 4, kind: input, shape index: {}]   ;;  %s3144_s5 = inlined_call_operand.vmem [shape: f32[2,1024], index: 5, kind: input, shape index: {}]   ;;  %s3145_s6 = inlined_call_operand.hbm [shape: f32[2,8], index: 6, kind: output, shape index: {}]  }
   0x1   :  { %12 = vsyncpa [#allocation6], 0 }
   0x2   :  { %13 = vsyncpa [#allocation4], 0  ;;  %s2552_s21 = smov [#allocation5]  }
   0x3   :  { %s29_s22 = sshll.u32 %s2552_s21, 4  ;;  %s30_s22 = int_to_ptr.vmem [resolvable:$true] %s29_s22 }
   0x4   :  { %s2474_s23 = scalar_lea.vmem %s30_s22, 256  ;;  %p2479_p1 = scmp.lt.s32.totalorder %s30_s22, %s30_s22 }
   0x5   :  { %p2475_p0 = scmp.ne.s32.totalorder %s30_s22, %s2474_s23  ;;  %p2480_p2 = scmp.lt.s32.totalorder %s2474_s23, %s2474_s23 }
   0x7   :  { %p2481_p3 = por %p2480_p2, %p2479_p1 }
   0x9   :  { %p2482_p4 = pnand %p2481_p3, %p2475_p0 }
   0xb   :  { %2485 = shalt.err (!%p2482_p4)
}
   0xc   :  { %s2553_s24 = smov 128   ;;  %s2554_s25 = smov 8  }
   0xd   :  { %35 = dma.hbm_to_vmem [thread:$0]  %s3140_s1, 256, %s30_s22, [#allocation6], %s2553_s24, %s2553_s24, %s2554_s25  }
   0xe   :  { %s2555_s28 = smov [#allocation2]   ;;  %s2556_s30 = smov [#allocation7]  }
   0xf   :  { %s20_s29 = sshll.u32 %s2555_s28, 4  ;;  %s41_s7 = sshll.u32 %s2556_s30, 4  ;;  %s21_s29 = int_to_ptr.vmem [resolvable:$true] %s20_s29  ;;  %s42_s7 = int_to_ptr.vmem [resolvable:$true] %s41_s7 }
  0x10   :  { %s2494_s8 = scalar_lea.vmem %s21_s29, 512  ;;  %p2499_p6 = scmp.lt.s32.totalorder %s21_s29, %s21_s29 }
  0x11   :  { %p2495_p5 = scmp.ne.s32.totalorder %s21_s29, %s2494_s8  ;;  %p2500_p7 = scmp.lt.s32.totalorder %s2494_s8, %s2494_s8 }
  0x13   :  { %p2501_p8 = por %p2500_p7, %p2499_p6 }
  0x15   :  { %p2502_p9 = pnand %p2501_p8, %p2495_p5 }
  0x17   :  { %2505 = shalt.err (!%p2502_p9)
}
  0x18   :  { %23 = dma.hbm_to_vmem [thread:$0]  %s3139_s0, 512, %s21_s29, [#allocation3]  }
  0x19   :  { %s2514_s11 = scalar_lea.vmem %s42_s7, 256  ;;  %p2519_p11 = scmp.lt.s32.totalorder %s42_s7, %s42_s7 }
  0x1a   :  { %p2515_p10 = scmp.ne.s32.totalorder %s42_s7, %s2514_s11  ;;  %p2520_p12 = scmp.lt.s32.totalorder %s2514_s11, %s2514_s11 }
  0x1c   :  { %p2521_p13 = por %p2520_p12, %p2519_p11 }
  0x1e   :  { %p2522_p0 = pnand %p2521_p13, %p2515_p10 }
  0x20   :  { %2525 = shalt.err (!%p2522_p0)
}
  0x21   :  { %47 = dma.hbm_to_vmem [thread:$0]  %s3141_s2, 256, %s42_s7, [#allocation6], %s2553_s24, %s2553_s24, %s2554_s25  }
  0x22   :  { %2546 = dma.done.wait [#allocation3], 512  }
  0x23   :  { %2547 = vsyncadd [#allocation3], 4294966784 }
  0x24   :  { %2548 = dma.done.wait [#allocation6], 512  }
  0x25   :  { %2549 = vsyncadd [#allocation6], 4294966784  ;;  %vm699_vm0 = vcmask 130048   ;;  %v2605_v0 = vld [vmem:[#allocation5 + $0x8] sm:$0xff]  ;;  %v2607_v1 = vld [vmem:[#allocation5] sm:$0xff]  ;;  %v67_v12 = vlaneseq  ;;  %v2557_v27 = vmov 0.0  }
  0x26   :  { %v2609_v2 = vld [vmem:[#allocation7] sm:$0xff]  ;;  %v1321_v3 = vmul.f32 %v2605_v0, %v2605_v0  ;;  %v698_v4 = vmul.f32 %v2607_v1, %v2607_v1  ;;  %v2617_v6 = vld [vmem:[#allocation7 + $0x8] sm:$0xff]  ;;  %v2628_v15 = vld [vmem:[#allocation2] sm:$0x77]  ;;  %vm387_vm2 = vcmask 1043456   ;;  %476 = vmatprep.mubr.f32.mxu0 %v2557_v27  ;;  %547 = vmatprep.mubr.f32.mxu1 %v2557_v27  ;;  %vm383_vm4 = vcmask 31744  }
  0x27   :  { %v713_v5 = vmul.f32 %v2609_v2, %v2609_v2  ;;  %v1335_v7 = vmul.f32 %v2617_v6, %v2617_v6  ;;  %v2625_v13 = vshrl.u32 %v67_v12, 7  ;;  %v2633_v19 = vld [vmem:[#allocation2 + $0x8] sm:$0x77]  ;;  %v2637_v24 = vld [vmem:[#allocation2 + $0x10] sm:$0x77]  ;;  %v382_v32 = vld [vmem:[%s3142_s3] sm:$0xff] }
  0x28   :  { %v1322_v8 = vsel %vm699_vm0, %v1321_v3, 0.0  ;;  %v700_v9 = vsel %vm699_vm0, %v698_v4, 0.0  ;;  %v2645_v30 = vld [vmem:[#allocation2 + $0x18] sm:$0x77]  ;;  %v2558_v60 = vmov 1.0   ;;  %s2560_s17 = smov [#allocation8]  }
  0x29   :  { %1323 = vadd.xlane.f32.xlu1 %v1322_v8  ;;  %701 = vadd.xlane.f32.xlu0 %v700_v9  ;;  %v714_v10 = vsel %vm699_vm0, %v713_v5, 0.0  ;;  %v1336_v11 = vsel %vm699_vm0, %v1335_v7, 0.0  ;;  %v75_v14 = vsub.s32 4, %v2625_v13  ;;  %v71_v16 = vsub.s32 0, %v2625_v13  ;;  %s2296_s18 = sshll.u32 %s2560_s17, 4  ;;  %s2297_s18 = int_to_ptr.vmem [resolvable:$true] %s2296_s18 }
  0x2a   :  { %v160_v42 = vsub.s32 1, %v2625_v13  ;;  %v2670_v44 = vadd.s32 8, %v2625_v13  ;;  %v164_v45 = vsub.s32 5, %v2625_v13  ;;  %v276_v59 = vsub.s32 6, %v2625_v13  ;;  %p2531_p2 = scmp.lt.s32.totalorder %s2297_s18, %s2297_s18 }
  0x2b   :  { %v76_v17 = vrot.slane %v2628_v15, %v75_v14  ;;  %v72_v18 = vrot.slane %v2628_v15, %v71_v16  ;;  %v84_v21 = vrot.slane %v2633_v19, %v75_v14  ;;  %v80_v23 = vrot.slane %v2633_v19, %v71_v16 }
  0x2c   :  { %v92_v26 = vrot.slane %v2637_v24, %v75_v14  ;;  %v88_v35 = vrot.slane %v2637_v24, %v71_v16  ;;  %v100_v36 = vrot.slane %v2645_v30, %v75_v14  ;;  %v96_v38 = vrot.slane %v2645_v30, %v71_v16 }
  0x2d   :  { %715 = vadd.xlane.f32.xlu0 %v714_v10  ;;  %1337 = vadd.xlane.f32.xlu1 %v1336_v11  ;;  %v108_v20 = vrot.slane %v76_v17, %v71_v16  ;;  %v104_v22 = vrot.slane %v72_v18, %v71_v16  ;;  %v116_v25 = vrot.slane %v84_v21, %v71_v16  ;;  %v272_v4 = vsub.s32 2, %v2625_v13 }
  0x2e   :  { %v112_v29 = vrot.slane %v80_v23, %v71_v16  ;;  %v124_v33 = vrot.slane %v92_v26, %v71_v16  ;;  %v120_v40 = vrot.slane %v88_v35, %v71_v16  ;;  %v132_v41 = vrot.slane %v100_v36, %v71_v16 }
  0x2f   :  { %vm134_vm1 = vcmp.eq.s32.totalorder %v108_v20, %v2625_v13  ;;  %vm133_vm3 = vcmp.eq.s32.totalorder %v104_v22, %v2625_v13  ;;  %vm136_vm5 = vcmp.eq.s32.totalorder %v116_v25, %v2625_v13  ;;  %v128_v43 = vrot.slane %v96_v38, %v71_v16 }
  0x30   :  { %v2307_v28 = vsel %vm134_vm1, 1.0, %v2557_v27  ;;  %v2306_v31 = vsel %vm133_vm3, 1.0, %v2557_v27  ;;  %v2309_v34 = vsel %vm136_vm5, 1.0, %v2557_v27  ;;  %vm135_vm6 = vcmp.eq.s32.totalorder %v112_v29, %v2625_v13 }
  0x31   :  { %2346 = vmatprep.subr.msk.mxu0 %vm387_vm2, %v2307_v28  ;;  %2349 = vmatprep.subr.msk.mxu1 %vm387_vm2, %v2309_v34  ;;  %v2308_v37 = vsel %vm135_vm6, 1.0, %v2557_v27  ;;  %vm138_vm7 = vcmp.eq.s32.totalorder %v124_v33, %v2625_v13  ;;  %vm137_vm8 = vcmp.eq.s32.totalorder %v120_v40, %v2625_v13  ;;  %vm140_vm9 = vcmp.eq.s32.totalorder %v132_v41, %v2625_v13 }
  0x32   :  { %2347 = vmatpush1.msk.msra.mxu0 %vm387_vm2, %v2306_v31  ;;  %2350 = vmatpush1.msk.msra.mxu1 %vm387_vm2, %v2308_v37  ;;  %v2311_v39 = vsel %vm138_vm7, 1.0, %v2557_v27  ;;  %v161_v46 = vrot.slane %v2628_v15, %v160_v42  ;;  %v169_v47 = vrot.slane %v2633_v19, %v160_v42  ;;  %v2310_v48 = vsel %vm137_vm8, 1.0, %v2557_v27 }
  0x33   :  { %2348 = vmatmul.mubr.msk.f32.vlgmr.msra.gmra.mxu0 %vm383_vm4, %v382_v32  ;;  %2351 = vmatmul.mubr.msk.f32.vlgmr.msra.gmra.mxu1 %vm383_vm4, %v382_v32  ;;  %v2313_v49 = vsel %vm140_vm9, 1.0, %v2557_v27  ;;  %vm139_vm10 = vcmp.eq.s32.totalorder %v128_v43, %v2625_v13  ;;  %v165_v50 = vrot.slane %v2628_v15, %v164_v45  ;;  %v173_v52 = vrot.slane %v2633_v19, %v164_v45 }
  0x34   :  { %618 = vmatprep.mubr.f32.mxu0 %v2557_v27  ;;  %2352 = vmatprep.subr.msk.mxu0 %vm387_vm2, %v2311_v39  ;;  %v2312_v51 = vsel %vm139_vm10, 1.0, %v2557_v27  ;;  %v2686_v53 = vrot.slane %v161_v46, %v160_v42  ;;  %v2688_v54 = vrot.slane %v169_v47, %v160_v42  ;;  %v181_v56 = vrot.slane %v2637_v24, %v164_v45 }
  0x35   :  { %689 = vmatprep.mubr.f32.mxu1 %v2557_v27  ;;  %2353 = vmatpush1.msk.msra.mxu0 %vm387_vm2, %v2310_v48  ;;  %v2692_v55 = vrot.slane %v165_v50, %v160_v42  ;;  %v189_v57 = vrot.slane %v2645_v30, %v164_v45  ;;  %v2697_v58 = vrot.slane %v173_v52, %v160_v42 }
  0x36   :  { %2355 = vmatprep.subr.msk.mxu1 %vm387_vm2, %v2313_v49  ;;  %vm3153_vm11 = vcmp.eq.s32.totalorder %v2686_v53, %v2670_v44  ;;  %vm3152_vm12 = vcmp.eq.s32.totalorder %v2688_v54, %v2670_v44  ;;  %vm3149_vm13 = vcmp.eq.s32.totalorder %v2686_v53, %v2625_v13  ;;  %vm3148_vm1 = vcmp.eq.s32.totalorder %v2688_v54, %v2625_v13 }
  0x37   :  { %2354 = vmatmul.mubr.msk.f32.vlgmr.msra.gmra.mxu0 %vm383_vm4, %v382_v32  ;;  %2356 = vmatpush1.msk.msra.mxu1 %vm387_vm2, %v2312_v51  ;;  %vm3155_vm14 = vcmp.eq.s32.totalorder %v2692_v55, %v2670_v44  ;;  %vm3151_vm15 = vcmp.eq.s32.totalorder %v2692_v55, %v2625_v13  ;;  %vm3154_vm2 = vcmp.eq.s32.totalorder %v2697_v58, %v2670_v44 }
  0x38   :  { %2357 = vmatmul.mubr.msk.f32.vlgmr.msra.gmra.mxu1 %vm383_vm4, %v382_v32  ;;  %794 = vmatprep.mubr.f32.mxu0 %v2557_v27  ;;  %vm3150_vm3 = vcmp.eq.s32.totalorder %v2697_v58, %v2625_v13  ;;  %v2722_v61 = vrot.slane %v181_v56, %v160_v42  ;;  %v2724_v62 = vrot.slane %v189_v57, %v160_v42 }
  0x39   :  { %865 = vmatprep.mubr.f32.mxu1 %v2557_v27  ;;  %2358 = vmatprep.subr.msk.mxu0 %vm3155_vm14, %v2558_v60  ;;  %v177_v63 = vrot.slane %v2637_v24, %v160_v42  ;;  %v185_v3 = vrot.slane %v2645_v30, %v160_v42  ;;  %v277_v5 = vrot.slane %v2628_v15, %v276_v59 }
  0x3a   :  { %2363 = vmatprep.subr.msk.mxu1 %vm3154_vm2, %v2558_v60  ;;  %2359 = vmatpush1.msk.msra.mxu0 %vm3153_vm11, %v2558_v60  ;;  %vm3147_vm4 = vcmp.eq.s32.totalorder %v2722_v61, %v2670_v44  ;;  %vm3146_vm5 = vcmp.eq.s32.totalorder %v2724_v62, %v2670_v44  ;;  %v285_v10 = vrot.slane %v2633_v19, %v276_v59 }
  0x3b   :  { %2364 = vmatpush1.msk.msra.mxu1 %vm3152_vm12, %v2558_v60  ;;  %2360 = vmatprep.subr.msk.mxu0 %vm3151_vm15, %v2558_v60  ;;  %v2758_v7 = vrot.slane %v177_v63, %v160_v42  ;;  %v2760_v8 = vrot.slane %v185_v3, %v160_v42  ;;  %v2770_v9 = vrot.slane %v277_v5, %v272_v4 }
  0x3c   :  { %2365 = vmatprep.subr.msk.mxu1 %vm3150_vm3, %v2558_v60  ;;  %2361 = vmatpush1.msk.msra.mxu0 %vm3149_vm13, %v2558_v60  ;;  %v273_v11 = vrot.slane %v2628_v15, %v272_v4  ;;  %v2784_v12 = vrot.slane %v285_v10, %v272_v4  ;;  %v281_v15 = vrot.slane %v2633_v19, %v272_v4 }
  0x3d   :  { %2366 = vmatpush1.msk.msra.mxu1 %vm3148_vm1, %v2558_v60  ;;  %2368 = vmatprep.subr.msk.mxu0 %vm3147_vm4, %v2558_v60  ;;  %vm234_vm6 = vcmp.eq.s32.totalorder %v2758_v7, %v2670_v44  ;;  %vm236_vm7 = vcmp.eq.s32.totalorder %v2760_v8, %v2670_v44  ;;  %vm3158_vm8 = vcmp.eq.s32.totalorder %v2770_v9, %v2670_v44 }
  0x3e   :  { %2373 = vmatprep.subr.msk.mxu1 %vm3146_vm5, %v2558_v60  ;;  %v2786_v14 = vrot.slane %v273_v11, %v272_v4  ;;  %v293_v16 = vrot.slane %v2637_v24, %v276_v59  ;;  %vm3159_vm9 = vcmp.eq.s32.totalorder %v2784_v12, %v2670_v44  ;;  %v2794_v17 = vrot.slane %v281_v15, %v272_v4 }
  0x3f   :  { %v301_v20 = vrot.slane %v2645_v30, %v276_v59  ;;  %v289_v21 = vrot.slane %v2637_v24, %v272_v4  ;;  %v297_v19 = vrot.slane %v2645_v30, %v272_v4 }
  0x40   :  { %vm342_vm10 = vcmp.eq.s32.totalorder %v2786_v14, %v2670_v44  ;;  %v2796_v18 = vrot.slane %v293_v16, %v272_v4  ;;  %vm344_vm5 = vcmp.eq.s32.totalorder %v2794_v17, %v2670_v44 }
  0x41   :  { %v2805_v22 = vrot.slane %v301_v20, %v272_v4  ;;  %v2807_v23 = vrot.slane %v289_v21, %v272_v4  ;;  %v2809_v25 = vrot.slane %v297_v19, %v272_v4 }
  0x42   :  { %vm3163_vm4 = vcmp.eq.s32.totalorder %v2796_v18, %v2670_v44 }
  0x43   :  { %vm349_vm1 = vcmp.eq.s32.totalorder %v2805_v22, %v2670_v44  ;;  %vm346_vm13 = vcmp.eq.s32.totalorder %v2807_v23, %v2670_v44  ;;  %vm348_vm3 = vcmp.eq.s32.totalorder %v2809_v25, %v2670_v44 }
  0xb2   :  { %v702_v24 = vpop.xlane.xlu0 %701  ;;  %v1324_v30 = vpop.xlane.xlu1 %1323 }
  0xb3   :  { %v703_v26 = vadd.f32 1e-06, %v702_v24  ;;  %v1325_v31 = vadd.f32 1e-06, %v1324_v30 }
  0xb5   :  { %2450 = vrsqrt.f32 %v703_v26  ;;  %vm706_vm15 = vcmp.eq.f32.partialorder %v703_v26, inf  ;;  %v709_v34 = vand.u32 2147483648, %v703_v26  ;;  %vm708_vm12 = vcmp.eq.f32.partialorder %v703_v26, 0.0 }
  0xb6   :  { %v716_v28 = vpop.xlane.xlu0 %715  ;;  %v1338_v39 = vpop.xlane.xlu1 %1337  ;;  %vm1328_vm14 = vcmp.eq.f32.partialorder %v1325_v31, inf  ;;  %v1331_v48 = vand.u32 2147483648, %v1325_v31 }
  0xb7   :  { %v717_v29 = vadd.f32 1e-06, %v716_v28  ;;  %v2817_v41 = vadd.f32 1e-06, %v1338_v39 }
  0xb9   :  { %2452 = vrsqrt.f32 %v717_v29  ;;  %vm720_vm11 = vcmp.eq.f32.partialorder %v717_v29, inf  ;;  %v723_v42 = vand.u32 2147483648, %v717_v29  ;;  %vm722_vm2 = vcmp.eq.f32.partialorder %v717_v29, 0.0 }
  0xba   :  { %2454 = vrsqrt.f32 %v1325_v31  ;;  %v1345_v59 = vand.u32 2147483648, %v2817_v41 }
  0xc2   :  { %v2451_v32 = vpop.eup %2450 }
  0xc3   :  { %v705_v33 = vmul.f32 %v2451_v32, %v703_v26 }
  0xc5   :  { %v707_v36 = vsel %vm706_vm15, %v703_v26, %v705_v33  ;;  %vm229_vm15 = vcmp.eq.s32.totalorder %v2724_v62, %v2625_v13 }
  0xc6   :  { %v2453_v35 = vpop.eup %2452  ;;  %v710_v37 = vsel %vm708_vm12, %v709_v34, %v707_v36  ;;  %vm1330_vm12 = vcmp.eq.f32.partialorder %v1325_v31, 0.0 }
  0xc7   :  { %v719_v38 = vmul.f32 %v2453_v35, %v717_v29  ;;  %2456 = vrcp.f32 %v710_v37  ;;  %v2455_v45 = vpop.eup %2454 }
  0xc8   :  { %2458 = vrsqrt.f32 %v2817_v41  ;;  %v1327_v46 = vmul.f32 %v2455_v45, %v1325_v31 }
  0xc9   :  { %v721_v40 = vsel %vm720_vm11, %v717_v29, %v719_v38  ;;  %vm227_vm11 = vcmp.eq.s32.totalorder %v2722_v61, %v2625_v13 }
  0xca   :  { %v724_v43 = vsel %vm722_vm2, %v723_v42, %v721_v40  ;;  %v1329_v50 = vsel %vm1328_vm14, %v1325_v31, %v1327_v46  ;;  %vm3156_vm2 = vcmp.eq.s32.totalorder %v2758_v7, %v2625_v13  ;;  %vm3157_vm14 = vcmp.eq.s32.totalorder %v2760_v8, %v2625_v13  ;;  %v1961_v40 = vld [vmem:[%s3144_s5 + $0x8] sm:$0xff] }
  0xcb   :  { %2460 = vrcp.f32 %v724_v43 }
  0xd4   :  { %v2457_v47 = vpop.eup %2456 }
  0xd5   :  { %v712_v49 = vmul.f32 %v2457_v47, %v2607_v1  ;;  %v1332_v1 = vsel %vm1330_vm12, %v1331_v48, %v1329_v50  ;;  %v2459_v51 = vpop.eup %2458  ;;  %vm3162_vm12 = vcmp.eq.s32.totalorder %v2770_v9, %v2625_v13  ;;  %v1982_v50 = vcombine.high %v1961_v40, %v1961_v40 }
  0xd6   :  { %2462 = vrcp.f32 %v1332_v1  ;;  %v1341_v56 = vmul.f32 %v2459_v51, %v2817_v41 }
  0xd7   :  { %2362 = vmatmul.mubr.msk.f32.vlgmr.msra.gmra.mxu0 %vm699_vm0, %v712_v49  ;;  %2367 = vmatmul.mubr.msk.f32.vlgmr.msra.gmra.mxu1 %vm699_vm0, %v712_v49 }
  0xd8   :  { %2369 = vmatpush1.msk.msra.mxu0 %vm234_vm6, %v2558_v60  ;;  %2374 = vmatpush1.msk.msra.mxu1 %vm236_vm7, %v2558_v60  ;;  %v2461_v52 = vpop.eup %2460 }
  0xd9   :  { %2370 = vmatprep.subr.msk.mxu0 %vm227_vm11, %v2558_v60  ;;  %2375 = vmatprep.subr.msk.mxu1 %vm229_vm15, %v2558_v60  ;;  %v726_v57 = vmul.f32 %v2461_v52, %v2609_v2 }
  0xda   :  { %2371 = vmatpush1.msk.msra.mxu0 %vm3156_vm2, %v2558_v60  ;;  %936 = vmatprep.mubr.f32.mxu0 %v2557_v27  ;;  %vm3160_vm2 = vcmp.eq.s32.totalorder %v2784_v12, %v2625_v13 }
  0xdb   :  { %2376 = vmatpush1.msk.msra.mxu1 %vm3157_vm14, %v2558_v60  ;;  %1007 = vmatprep.mubr.f32.mxu1 %v2557_v27  ;;  %vm3161_vm14 = vcmp.eq.s32.totalorder %v2786_v14, %v2625_v13 }
  0xdc   :  { %2372 = vmatmul.mubr.msk.f32.vlgmr.msra.gmra.mxu0 %vm699_vm0, %v712_v49  ;;  %2377 = vmatmul.mubr.msk.f32.vlgmr.msra.gmra.mxu1 %vm699_vm0, %v712_v49 }
  0xdd   :  { %2378 = vmatprep.subr.msk.mxu0 %vm3158_vm8, %v2558_v60  ;;  %2383 = vmatprep.subr.msk.mxu1 %vm3159_vm9, %v2558_v60  ;;  %vm336_vm8 = vcmp.eq.s32.totalorder %v2794_v17, %v2625_v13  ;;  %vm1342_vm9 = vcmp.eq.f32.partialorder %v2817_v41, inf }
  0xde   :  { %2379 = vmatpush1.msk.msra.mxu0 %vm342_vm10, %v2558_v60  ;;  %2384 = vmatpush1.msk.msra.mxu1 %vm344_vm5, %v2558_v60  ;;  %v1343_v63 = vsel %vm1342_vm9, %v2817_v41, %v1341_v56  ;;  %vm3164_vm9 = vcmp.eq.s32.totalorder %v2807_v23, %v2625_v13 }
  0xdf   :  { %2380 = vmatprep.subr.msk.mxu0 %vm3162_vm12, %v2558_v60  ;;  %2385 = vmatprep.subr.msk.mxu1 %vm3160_vm2, %v2558_v60  ;;  %vm1344_vm2 = vcmp.eq.f32.partialorder %v2817_v41, 0.0  ;;  %vm3166_vm12 = vcmp.eq.s32.totalorder %v2805_v22, %v2625_v13 }
  0xe0   :  { %2381 = vmatpush1.msk.msra.mxu0 %vm3161_vm14, %v2558_v60  ;;  %1081 = vmatprep.mubr.f32.mxu0 %v2557_v27  ;;  %vm3167_vm14 = vcmp.eq.s32.totalorder %v2796_v18, %v2625_v13  ;;  %v1346_v2 = vsel %vm1344_vm2, %v1345_v59, %v1343_v63  ;;  %vm3168_vm2 = vcmp.eq.s32.totalorder %v2692_v55, %v2670_v44 }
  0xe1   :  { %2386 = vmatpush1.msk.msra.mxu1 %vm336_vm8, %v2558_v60  ;;  %1152 = vmatprep.mubr.f32.mxu1 %v2557_v27  ;;  %2464 = vrcp.f32 %v1346_v2 }
  0xe2   :  { %2382 = vmatmul.mubr.msk.f32.vlgmr.msra.gmra.mxu0 %vm699_vm0, %v726_v57  ;;  %2387 = vmatmul.mubr.msk.f32.vlgmr.msra.gmra.mxu1 %vm699_vm0, %v726_v57 }
  0xe3   :  { %2388 = vmatprep.subr.msk.mxu0 %vm3163_vm4, %v2558_v60  ;;  %2393 = vmatprep.subr.msk.mxu1 %vm349_vm1, %v2558_v60  ;;  %vm3165_vm4 = vcmp.eq.s32.totalorder %v2809_v25, %v2625_v13  ;;  %v2463_v3 = vpop.eup %2462 }
  0xe4   :  { %2389 = vmatpush1.msk.msra.mxu0 %vm346_vm13, %v2558_v60  ;;  %2394 = vmatpush1.msk.msra.mxu1 %vm348_vm3, %v2558_v60  ;;  %v1334_v4 = vmul.f32 %v2463_v3, %v2605_v0 }
  0xe5   :  { %2390 = vmatprep.subr.msk.mxu0 %vm3167_vm14, %v2558_v60  ;;  %2395 = vmatprep.subr.msk.mxu1 %vm3166_vm12, %v2558_v60  ;;  %vm3171_vm12 = vcmp.eq.s32.totalorder %v2688_v54, %v2670_v44  ;;  %vm3172_vm14 = vcmp.eq.s32.totalorder %v2692_v55, %v2625_v13  ;;  %v1960_v55 = vld [vmem:[%s3144_s5] sm:$0xff] }
  0xe6   :  { %2391 = vmatpush1.msk.msra.mxu0 %vm3164_vm9, %v2558_v60  ;;  %1223 = vmatprep.mubr.f32.mxu0 %v2557_v27  ;;  %vm3169_vm9 = vcmp.eq.s32.totalorder %v2697_v58, %v2670_v44 }
  0xe7   :  { %2396 = vmatpush1.msk.msra.mxu1 %vm3165_vm4, %v2558_v60  ;;  %1294 = vmatprep.mubr.f32.mxu1 %v2557_v27  ;;  %vm3170_vm4 = vcmp.eq.s32.totalorder %v2686_v53, %v2670_v44 }
  0xe8   :  { %2392 = vmatmul.mubr.msk.f32.vlgmr.msra.gmra.mxu0 %vm699_vm0, %v726_v57  ;;  %2397 = vmatmul.mubr.msk.f32.vlgmr.msra.gmra.mxu1 %vm699_vm0, %v726_v57 }
  0xe9   :  { %2398 = vmatprep.subr.msk.mxu0 %vm3168_vm2, %v2558_v60  ;;  %2403 = vmatprep.subr.msk.mxu1 %vm3169_vm9, %v2558_v60  ;;  %vm3173_vm2 = vcmp.eq.s32.totalorder %v2697_v58, %v2625_v13  ;;  %vm3174_vm9 = vcmp.eq.s32.totalorder %v2686_v53, %v2625_v13 }
  0xea   :  { %2399 = vmatpush1.msk.msra.mxu0 %vm3170_vm4, %v2558_v60  ;;  %2404 = vmatpush1.msk.msra.mxu1 %vm3171_vm12, %v2558_v60  ;;  %vm3175_vm4 = vcmp.eq.s32.totalorder %v2688_v54, %v2625_v13  ;;  %vm3177_vm12 = vcmp.eq.s32.totalorder %v2724_v62, %v2670_v44 }
  0xeb   :  { %2400 = vmatprep.subr.msk.mxu0 %vm3172_vm14, %v2558_v60  ;;  %2405 = vmatprep.subr.msk.mxu1 %vm3173_vm2, %v2558_v60  ;;  %vm3176_vm14 = vcmp.eq.s32.totalorder %v2722_v61, %v2670_v44  ;;  %vm3178_vm2 = vcmp.eq.s32.totalorder %v2758_v7, %v2625_v13  ;;  %v1965_v61 = vcombine.high %v1960_v55, %v1960_v55 }
  0xec   :  { %2401 = vmatpush1.msk.msra.mxu0 %vm3174_vm9, %v2558_v60  ;;  %1416 = vmatprep.mubr.f32.mxu0 %v2557_v27  ;;  %vm3183_vm9 = vcmp.eq.s32.totalorder %v2784_v12, %v2625_v13 }
  0xed   :  { %2406 = vmatpush1.msk.msra.mxu1 %vm3175_vm4, %v2558_v60  ;;  %1487 = vmatprep.mubr.f32.mxu1 %v2557_v27  ;;  %vm3184_vm4 = vcmp.eq.s32.totalorder %v2786_v14, %v2625_v13 }
  0xee   :  { %2402 = vmatmul.mubr.msk.f32.vlgmr.msra.gmra.mxu0 %vm699_vm0, %v1334_v4  ;;  %2407 = vmatmul.mubr.msk.f32.vlgmr.msra.gmra.mxu1 %vm699_vm0, %v1334_v4  ;;  %v2465_v0 = vpop.eup %2464 }
  0xef   :  { %2408 = vmatprep.subr.msk.mxu0 %vm3176_vm14, %v2558_v60  ;;  %2413 = vmatprep.subr.msk.mxu1 %vm3177_vm12, %v2558_v60  ;;  %v1348_v53 = vmul.f32 %v2465_v0, %v2617_v6  ;;  %v2559_v6 = vmov 1983009808  }
  0xf0   :  { %2409 = vmatpush1.msk.msra.mxu0 %vm234_vm6, %v2558_v60  ;;  %2414 = vmatpush1.msk.msra.mxu1 %vm236_vm7, %v2558_v60  ;;  %vm3179_vm6 = vcmp.eq.s32.totalorder %v2760_v8, %v2625_v13  ;;  %vm3180_vm7 = vcmp.eq.s32.totalorder %v2770_v9, %v2670_v44 }
  0xf1   :  { %2410 = vmatprep.subr.msk.mxu0 %vm227_vm11, %v2558_v60  ;;  %2415 = vmatprep.subr.msk.mxu1 %vm229_vm15, %v2558_v60  ;;  %vm3181_vm11 = vcmp.eq.s32.totalorder %v2784_v12, %v2670_v44  ;;  %vm3182_vm15 = vcmp.eq.s32.totalorder %v2770_v9, %v2625_v13 }
  0xf2   :  { %2411 = vmatpush1.msk.msra.mxu0 %vm3178_vm2, %v2558_v60  ;;  %1558 = vmatprep.mubr.f32.mxu0 %v2557_v27 }
  0xf3   :  { %2416 = vmatpush1.msk.msra.mxu1 %vm3179_vm6, %v2558_v60  ;;  %1629 = vmatprep.mubr.f32.mxu1 %v2557_v27  ;;  %v3111_v7 = vpop.f32.mrf.mxu1  ;;  %v478_v8 = vpop.f32.mrf.mxu0 }
  0xf4   :  { %2412 = vmatmul.mubr.msk.f32.vlgmr.msra.gmra.mxu0 %vm699_vm0, %v1334_v4  ;;  %2417 = vmatmul.mubr.msk.f32.vlgmr.msra.gmra.mxu1 %vm699_vm0, %v1334_v4 }
  0xf5   :  { %2418 = vmatprep.subr.msk.mxu0 %vm3180_vm7, %v2558_v60  ;;  %2423 = vmatprep.subr.msk.mxu1 %vm3181_vm11, %v2558_v60  ;;  %v551_v9 = vpop.f32.mrf.mxu1  ;;  %v480_v10 = vpop.f32.mrf.mxu0 }
  0xf6   :  { %2419 = vmatpush1.msk.msra.mxu0 %vm342_vm10, %v2558_v60  ;;  %2424 = vmatpush1.msk.msra.mxu1 %vm344_vm5, %v2558_v60  ;;  %vm3185_vm5 = vcmp.eq.s32.totalorder %v2796_v18, %v2670_v44  ;;  %vm3187_vm10 = vcmp.eq.s32.totalorder %v2805_v22, %v2625_v13  ;;  %v1967_v44 = vunpack.c.l.s4 %v2559_v6 }
  0xf7   :  { %2420 = vmatprep.subr.msk.mxu0 %vm3182_vm15, %v2558_v60  ;;  %2425 = vmatprep.subr.msk.mxu1 %vm3183_vm9, %v2558_v60 }
  0xf8   :  { %2421 = vmatpush1.msk.msra.mxu0 %vm3184_vm4, %v2558_v60  ;;  %1703 = vmatprep.mubr.f32.mxu0 %v2557_v27  ;;  %v1968_v54 = vunpack.c.0.s8 %v1967_v44  ;;  %v3113_v11 = vpop.f32.mrf.mxu1 }
  0xf9   :  { %2426 = vmatpush1.msk.msra.mxu1 %vm336_vm8, %v2558_v60  ;;  %1774 = vmatprep.mubr.f32.mxu1 %v2557_v27  ;;  %vm3186_vm8 = vcmp.eq.s32.totalorder %v2796_v18, %v2625_v13 }
  0xfa   :  { %2422 = vmatmul.mubr.msk.f32.vlgmr.msra.gmra.mxu0 %vm699_vm0, %v1348_v53  ;;  %2427 = vmatmul.mubr.msk.f32.vlgmr.msra.gmra.mxu1 %vm699_vm0, %v1348_v53  ;;  %v1971_v58 = vsub.s32 %v1968_v54, %v2625_v13  ;;  %v3117_v12 = vpop.f32.mrf.mxu1 }
  0xfb   :  { %2428 = vmatprep.subr.msk.mxu0 %vm3185_vm5, %v2558_v60  ;;  %2433 = vmatprep.subr.msk.mxu1 %vm349_vm1, %v2558_v60  ;;  %vm3188_vm1 = vcmp.eq.s32.totalorder %v2807_v23, %v2625_v13 }
  0xfc   :  { %2429 = vmatpush1.msk.msra.mxu0 %vm346_vm13, %v2558_v60  ;;  %2434 = vmatpush1.msk.msra.mxu1 %vm348_vm3, %v2558_v60  ;;  %vm3189_vm13 = vcmp.eq.s32.totalorder %v2809_v25, %v2625_v13  ;;  %v3103_v62 = vrot.slane %v1960_v55, %v1971_v58  ;;  %v3105_v5 = vrot.slane %v1965_v61, %v1971_v58  ;;  %v3115_v13 = vpop.f32.mrf.mxu0 }
  0xfd   :  { %2430 = vmatprep.subr.msk.mxu0 %vm3186_vm8, %v2558_v60  ;;  %2435 = vmatprep.subr.msk.mxu1 %vm3187_vm10, %v2558_v60  ;;  %v1989_v0 = vrot.slane %v1961_v40, %v1971_v58 }
  0xfe   :  { %2431 = vmatpush1.msk.msra.mxu0 %vm3188_vm1, %v2558_v60  ;;  %1845 = vmatprep.mubr.f32.mxu0 %v2557_v27  ;;  %v3119_v14 = vpop.f32.mrf.mxu0 }
  0xff   :  { %2436 = vmatpush1.msk.msra.mxu1 %vm3189_vm13, %v2558_v60  ;;  %1916 = vmatprep.mubr.f32.mxu1 %v2557_v27  ;;  %v1980_v27 = vcombine.high %v3103_v62, %v3103_v62  ;;  %v1981_v60 = vcombine.high %v3105_v5, %v3105_v5 }
 0x100   :  { %2432 = vmatmul.mubr.msk.f32.vlgmr.msra.gmra.mxu0 %vm699_vm0, %v1348_v53  ;;  %2437 = vmatmul.mubr.msk.f32.vlgmr.msra.gmra.mxu1 %vm699_vm0, %v1348_v53  ;;  %v1996_v53 = vrot.slane %v1982_v50, %v1971_v58  ;;  %v1997_v58 = vcombine.high %v1989_v0, %v1989_v0  ;;  %vm1958_vm0 = vcmask 58368  }
 0x101   :  { %2071 = vmatprep.mubr.f32.mxu0 %v1980_v27  ;;  %2141 = vmatprep.mubr.f32.mxu1 %v1981_v60 }
 0x197   :  { %v796_v15 = vpop.f32.mrf.mxu0  ;;  %v867_v16 = vpop.f32.mrf.mxu1 }
 0x199   :  { %v798_v17 = vpop.f32.mrf.mxu0  ;;  %v869_v18 = vpop.f32.mrf.mxu1 }
 0x19c   :  { %v938_v20 = vpop.f32.mrf.mxu0  ;;  %v1009_v21 = vpop.f32.mrf.mxu1 }
 0x19e   :  { %v940_v19 = vpop.f32.mrf.mxu0  ;;  %v1011_v22 = vpop.f32.mrf.mxu1 }
 0x1a2   :  { %v1083_v23 = vpop.f32.mrf.mxu0  ;;  %v1154_v25 = vpop.f32.mrf.mxu1 }
 0x1a3   :  { %v1301_v46 = vmul.f32 %v1083_v23, %v796_v15  ;;  %v1303_v47 = vmul.f32 %v1154_v25, %v867_v16 }
 0x1a4   :  { %v1085_v24 = vpop.f32.mrf.mxu0  ;;  %v1156_v26 = vpop.f32.mrf.mxu1 }
 0x1a5   :  { %v1302_v1 = vmul.f32 %v1085_v24, %v798_v17  ;;  %v1304_v51 = vmul.f32 %v1156_v26, %v869_v18 }
 0x1a8   :  { %v1225_v28 = vpop.f32.mrf.mxu0  ;;  %v1296_v29 = vpop.f32.mrf.mxu1 }
 0x1a9   :  { %v1305_v61 = vmul.f32 %v1225_v28, %v938_v20  ;;  %v1307_v27 = vmul.f32 %v1296_v29, %v1009_v21  ;;  %v1998_v20 = vcombine.high %v1996_v53, %v1996_v53 }
 0x1aa   :  { %v1227_v30 = vpop.f32.mrf.mxu0  ;;  %v1298_v31 = vpop.f32.mrf.mxu1 }
 0x1ab   :  { %v1306_v60 = vmul.f32 %v1227_v30, %v940_v19  ;;  %v1308_v18 = vmul.f32 %v1298_v31, %v1011_v22 }
 0x1ae   :  { %v1418_v32 = vpop.f32.mrf.mxu0  ;;  %v1489_v33 = vpop.f32.mrf.mxu1 }
 0x1b0   :  { %v1420_v34 = vpop.f32.mrf.mxu0  ;;  %v1491_v35 = vpop.f32.mrf.mxu1 }
 0x1b4   :  { %v1560_v36 = vpop.f32.mrf.mxu0  ;;  %v1631_v37 = vpop.f32.mrf.mxu1 }
 0x1b6   :  { %v1562_v38 = vpop.f32.mrf.mxu0  ;;  %v1633_v39 = vpop.f32.mrf.mxu1 }
 0x1ba   :  { %v1705_v41 = vpop.f32.mrf.mxu0  ;;  %v1776_v42 = vpop.f32.mrf.mxu1 }
 0x1bb   :  { %v1923_v43 = vmul.f32 %v1705_v41, %v1418_v32  ;;  %v1925_v45 = vmul.f32 %v1776_v42, %v1489_v33 }
 0x1bc   :  { %v1707_v48 = vpop.f32.mrf.mxu0  ;;  %v1778_v49 = vpop.f32.mrf.mxu1 }
 0x1bd   :  { %v1924_v52 = vmul.f32 %v1707_v48, %v1420_v34  ;;  %v1926_v56 = vmul.f32 %v1778_v49, %v1491_v35  ;;  %v1931_v57 = vadd.f32 %v1923_v43, %v1301_v46  ;;  %v1933_v59 = vadd.f32 %v1925_v45, %v1303_v47 }
 0x1bf   :  { %v1932_v63 = vadd.f32 %v1924_v52, %v1302_v1  ;;  %v1934_v2 = vadd.f32 %v1926_v56, %v1304_v51  ;;  %v1939_v15 = vmul.f32 %v1931_v57, %v478_v8  ;;  %v1941_v23 = vmul.f32 %v1933_v59, %v3111_v7 }
 0x1c0   :  { %v1847_v3 = vpop.f32.mrf.mxu0  ;;  %v1918_v4 = vpop.f32.mrf.mxu1 }
 0x1c1   :  { %v1927_v6 = vmul.f32 %v1847_v3, %v1560_v36  ;;  %v1929_v44 = vmul.f32 %v1918_v4, %v1631_v37  ;;  %v1940_v54 = vmul.f32 %v1932_v63, %v480_v10  ;;  %v1942_v55 = vmul.f32 %v1934_v2, %v551_v9 }
 0x1c2   :  { %v1849_v16 = vpop.f32.mrf.mxu0  ;;  %v1920_v17 = vpop.f32.mrf.mxu1 }
 0x1c3   :  { %v1928_v25 = vmul.f32 %v1849_v16, %v1562_v38  ;;  %v1930_v24 = vmul.f32 %v1920_v17, %v1633_v39  ;;  %2037 = vmatprep.subr.mxu0 %v1940_v54  ;;  %v1935_v26 = vadd.f32 %v1927_v6, %v1305_v61  ;;  %v1937_v32 = vadd.f32 %v1929_v44, %v1307_v27 }
 0x1c4   :  { %2107 = vmatprep.subr.mxu1 %v1942_v55  ;;  %2038 = vmatpush1.xpose.msra.mxu0 %v1939_v15 }
 0x1c5   :  { %v1936_v33 = vadd.f32 %v1928_v25, %v1306_v60  ;;  %v1938_v10 = vadd.f32 %v1930_v24, %v1308_v18  ;;  %2108 = vmatpush1.xpose.msra.mxu1 %v1941_v23  ;;  %v1943_v7 = vmul.f32 %v1935_v26, %v3115_v13  ;;  %v1945_v21 = vmul.f32 %v1937_v32, %v3113_v11 }
 0x1c7   :  { %2072 = vmatmul.mubr.f32.vlgmr.msra.gmra.mxu0 %v3103_v62  ;;  %v1944_v8 = vmul.f32 %v1936_v33, %v3119_v14  ;;  %v1946_v9 = vmul.f32 %v1938_v10, %v3117_v12  ;;  %v2438_v62 = vld [vmem:[%s3143_s4] ss:$0 sm:$0xff]  ;;  %s2526_s4 = scalar_lea.vmem %s2297_s18, 32 }
 0x1c8   :  { %2142 = vmatmul.mubr.f32.vlgmr.msra.gmra.mxu1 %v3105_v5  ;;  %2211 = vmatprep.mubr.f32.mxu0 %v1997_v58  ;;  %1959 = vst.msk [vmem:[#allocation8] sm:$0x3] %vm1958_vm0, %v2438_v62  ;;  %p2527_p1 = scmp.ne.s32.totalorder %s2297_s18, %s2526_s4  ;;  %p2532_p3 = scmp.lt.s32.totalorder %s2526_s4, %s2526_s4 }
 0x1c9   :  { %2177 = vmatprep.subr.mxu0 %v1944_v8  ;;  %2247 = vmatprep.subr.mxu1 %v1946_v9 }
 0x1ca   :  { %2178 = vmatpush1.xpose.msra.mxu0 %v1943_v7  ;;  %2248 = vmatpush1.xpose.msra.mxu1 %v1945_v21  ;;  %p2533_p4 = por %p2532_p3, %p2531_p2 }
 0x1cb   :  { %2281 = vmatprep.mubr.f32.mxu1 %v1998_v20 }
 0x1cc   :  { %p2534_p5 = pnand %p2533_p4, %p2527_p1 }
 0x1cd   :  { %2212 = vmatmul.mubr.f32.vlgmr.msra.gmra.mxu0 %v1989_v0  ;;  %2282 = vmatmul.mubr.f32.vlgmr.msra.gmra.mxu1 %v1996_v53 }
 0x1cf   :  { %v1962_v29 = vld [vmem:[#allocation8] sm:$0x3] }
 0x287   :  { %v2073_v13 = vpop.f32.mrf.mxu0 }
 0x288   :  { %v2143_v12 = vpop.f32.mrf.mxu1 }
 0x289   :  { %v2075_v11 = vpop.f32.mrf.mxu0  ;;  %v2144_v5 = vadd.f32 %v2143_v12, %v2073_v13 }
 0x28a   :  { %v2145_v14 = vpop.f32.mrf.mxu1 }
 0x28d   :  { %v2213_v19 = vpop.f32.mrf.mxu0  ;;  %v2283_v22 = vpop.f32.mrf.mxu1 }
 0x28e   :  { %v2214_v28 = vadd.f32 %v2213_v19, %v2144_v5 }
 0x28f   :  { %v2215_v30 = vpop.f32.mrf.mxu0  ;;  %v2285_v31 = vpop.f32.mrf.mxu1 }
 0x290   :  { %v2284_v34 = vadd.f32 %v2283_v22, %v2214_v28 }
 0x292   :  { %v2287_v35 = vadd.f32 %v2284_v34, %v1962_v29 }
 0x294   :  { %2289 = vst.msk [vmem:[#allocation8] sm:$0x3] %vm1958_vm0, %v2287_v35 }
 0x295   :  { %2537 = shalt.err (!%p2534_p5)
}
 0x296   :  { %2299 = dma.vmem_to_hbm [thread:$0]  %s2297_s18, 32, %s3145_s6, [#allocation4]  }
 0x297   :  { %2550 = dma.done.wait [#allocation4], 32  }
 0x298   :  { %2551 = vsyncadd [#allocation4], 4294967264 }
 0x299   :  { %2303 = vsyncpa [#allocation3], 1 }
 0x29a   :  { %2304 = vsyncpa [#allocation6], 1 }
 0x29b   :  { %2305 = vsyncpa [#allocation4], 1 }

</bundles_post_ra>
